<compile_context>
chip_gen: v7x
topology: tpu7x:2x2x1
jax: 0.10.0
libtpu: 0.0.40
codegen_flags: <defaults>
</compile_context>

<pallas_src>
import jax
import jax.numpy as jnp
from jax.experimental import pallas as pl
from jax.experimental.pallas import tpu as pltpu

H1 = 128       # fc1 out features
H2 = 64        # fc2 out features
H2_PAD = 128   # fc2 out features padded to full MXU column width
_MIB = 1024 * 1024


def _round_up(n, m):
    return ((n + m - 1) // m) * m


def mlp_kernel(x_ref, w1_ref, b1_ref, w2_ref, b2_ref, w3_ref, b3_ref, o_ref):
    # Hot path: two full-width MXU matmuls (bf16 in, f32 acc) + VPU/XLU final layer,
    # all fused in VMEM for one tb-row tile of the batch.
    cd = w1_ref.dtype                       # compute dtype for MXU inputs (bf16)
    x = x_ref[...]
    if x.dtype != cd:                       # no-op when the producer streams bf16 x
        x = x.astype(cd)

    h1 = jnp.dot(x, w1_ref[...], preferred_element_type=jnp.float32) + b1_ref[...]
    h1 = jnp.maximum(h1, 0.0)               # ReLU (f32, VPU)

    h2 = jnp.dot(h1.astype(cd), w2_ref[...],
                 preferred_element_type=jnp.float32) + b2_ref[...]
    h2 = jnp.maximum(h2, 0.0)               # ReLU; padded cols 64..127 stay exactly 0

    # fc3 (out_features == 1): VPU multiply + lane reduction instead of a 1-wide MXU
    # matmul; w3 is a (1, 128) f32 row (padded lanes are 0), b3 is a scalar in SMEM.
    logits = jnp.sum(h2 * w3_ref[...], axis=-1, keepdims=True) + b3_ref[0]

    # sigmoid(x) == 0.5*(tanh(x/2)+1): numerically safe, lands on the EUP.
    o_ref[...] = (0.5 * (jnp.tanh(0.5 * logits) + 1.0)).astype(o_ref.dtype)


def _vmem_limit_bytes():
    """Per-chip scoped-VMEM limit: ~3/4 of physical, capped at 96 MiB.
    v5e/v6e (128 MiB) -> 96 MiB; v7x (64 MiB per TC) -> 48 MiB."""
    try:
        phys = int(pltpu.get_tpu_info().vmem_capacity_bytes)
    except Exception:
        phys = 64 * _MIB  # conservative fallback = v7x per-TC VMEM
    return max(32 * _MIB, min(phys * 3 // 4, 96 * _MIB))


def _choose_row_tile(B_pad, D, x_bytes, block_b, vmem_limit):
    """Largest row tile that (a) respects the VMEM budget including intermediates,
    (b) keeps the grid at >= ~4 steps when the batch allows, (c) honours block_b."""
    # Resident weight buffers (counted double-buffered to be safe even though their
    # index_map is constant): w1 bf16, b1 f32, w2 bf16, b2 f32, w3 f32.
    resident = 2 * (D * H1 * 2 + H1 * 4 + H1 * H2_PAD * 2 + H2_PAD * 4 + H2_PAD * 4)
    # Per-row bytes of one grid step's working set.
    per_row = (2 * D * x_bytes        # x tile (double buffered)
               + D * 2                # bf16 cast copy of x
               + H1 * 4 + H1 * 2      # h1 f32 + bf16 copy
               + H2_PAD * 4           # h2 f32
               + H2_PAD * 4           # h2 * w3 elementwise temp
               + 2 * 4)               # output tile (double buffered)
    tile_budget = int(vmem_limit * 3 // 4) - resident   # headroom for compiler temps
    max_tb_vmem = max(8, (tile_budget // per_row) // 8 * 8)
    # Keep >= ~4 grid steps when possible (v7x megacore sharding + healthy pipeline).
    max_tb_steps = max(8, (B_pad // 4) // 8 * 8)
    return max(8, min(_round_up(block_b, 8), max_tb_vmem, max_tb_steps, B_pad))


def binary_classifier_forward(x, kernel_params, *, block_b=8192):
    """x: (B, D) f32 or bf16 -> (B, 1) float32, matching the PyTorch module semantics.

    kernel_params comes from prepare_kernel_params (bf16 weights, padded fc2/fc3).
    block_b is the row-tile sweep knob (aim for >= ~1 MiB per x DMA on large batches).
    """
    w1, b1, w2, b2, w3_row, b3 = kernel_params
    B, D = x.shape
    x_bytes = jnp.dtype(x.dtype).itemsize

    # Pad only to the 8-row sublane granularity (usually a no-op). Partial last tiles
    # are handled by Pallas edge-block masking -- no full-array copy to a tb multiple.
    B_pad = _round_up(B, 8)
    if B_pad != B:
        x = jnp.pad(x, ((0, B_pad - B), (0, 0)))

    vmem_limit = _vmem_limit_bytes()
    tb = _choose_row_tile(B_pad, D, x_bytes, block_b, vmem_limit)
    grid = pl.cdiv(B_pad, tb)

    const2 = lambda i: (0, 0)  # weights/biases: same block every step -> VMEM-resident

    weight_bytes = (w1.size * w1.dtype.itemsize + b1.size * 4
                    + w2.size * w2.dtype.itemsize + b2.size * 4 + w3_row.size * 4 + 4)
    cost = pl.CostEstimate(
        flops=2 * B_pad * (D * H1 + H1 * H2_PAD + H2_PAD),
        transcendentals=B_pad,
        bytes_accessed=B_pad * D * x_bytes + B_pad * 4 + weight_bytes,
    )

    out = pl.pallas_call(
        mlp_kernel,
        out_shape=jax.ShapeDtypeStruct((B_pad, 1), jnp.float32),
        grid_spec=pltpu.PrefetchScalarGridSpec(
            num_scalar_prefetch=0,
            grid=(grid,),
            in_specs=[
                pl.BlockSpec((tb, D), lambda i: (i, 0)),     # x: streamed per row tile
                pl.BlockSpec(w1.shape, const2),              # (D, 128)   bf16
                pl.BlockSpec(b1.shape, const2),              # (1, 128)   f32
                pl.BlockSpec(w2.shape, const2),              # (128, 128) bf16 (padded)
                pl.BlockSpec(b2.shape, const2),              # (1, 128)   f32  (padded)
                pl.BlockSpec(w3_row.shape, const2),          # (1, 128)   f32  (padded row)
                pl.BlockSpec(memory_space=pltpu.MemorySpace.SMEM),  # b3 scalar in SMEM
            ],
            out_specs=pl.BlockSpec((tb, 1), lambda i: (i, 0)),
        ),
        compiler_params=pltpu.CompilerParams(
            dimension_semantics=("parallel",),   # batch tiles independent (megacore)
            vmem_limit_bytes=vmem_limit,
        ),
        cost_estimate=cost,
    )(x, w1, b1, w2, b2, w3_row, b3)

    return out[:B]


def init_params(key, embedding_dim):
    """Deterministic init mimicking nn.Linear default (uniform +/- 1/sqrt(fan_in)).
    Natural layout: weights (in, out) f32, biases (1, out) f32."""
    dims = [(embedding_dim, H1), (H1, H2), (H2, 1)]
    params = []
    for i, (fan_in, fan_out) in enumerate(dims):
        kw, kb = jax.random.split(jax.random.fold_in(key, i))
        bound = 1.0 / (fan_in ** 0.5)
        w = jax.random.uniform(kw, (fan_in, fan_out), jnp.float32, -bound, bound)
        b = jax.random.uniform(kb, (1, fan_out), jnp.float32, -bound, bound)
        params += [w, b]
    return tuple(params)


def prepare_kernel_params(params, compute_dtype=jnp.bfloat16):
    """One-time repack of the natural params into the kernel layout."""
    w1, b1, w2, b2, w3, b3 = params
    w1_k = w1.astype(compute_dtype)
    b1_k = b1.astype(jnp.float32)
    # fc2: zero-pad output columns 64 -> 128 (ReLU of the zero columns stays 0).
    w2_k = jnp.zeros((H1, H2_PAD), compute_dtype).at[:, :H2].set(w2.astype(compute_dtype))
    b2_k = jnp.zeros((1, H2_PAD), jnp.float32).at[:, :H2].set(b2.astype(jnp.float32))
    # fc3: stored as a (1, 128) f32 row for the VPU-multiply + lane-reduce epilogue.
    w3_k = jnp.zeros((1, H2_PAD), jnp.float32).at[:, :H2].set(
        w3[:, 0].astype(jnp.float32)[None, :])
    b3_k = b3.reshape((1,)).astype(jnp.float32)   # scalar bias -> 1D SMEM array
    return (w1_k, b1_k, w2_k, b2_k, w3_k, b3_k)


def reference_forward_mixed(x, params, compute_dtype=jnp.bfloat16):
    """Reference mirroring the kernel's precision policy (bf16 matmuls, f32 acc)."""
    w1, b1, w2, b2, w3, b3 = params
    cd = compute_dtype
    h1 = jnp.maximum(
        jnp.dot(x.astype(cd), w1.astype(cd), preferred_element_type=jnp.float32) + b1, 0.0)
    h2 = jnp.maximum(
        jnp.dot(h1.astype(cd), w2.astype(cd), preferred_element_type=jnp.float32) + b2, 0.0)
    return jax.nn.sigmoid(jnp.dot(h2, w3) + b3)


def reference_forward_f32(x, params):
    """Pure-f32 reference matching the PyTorch module exactly."""
    w1, b1, w2, b2, w3, b3 = params
    h = jax.nn.relu(x @ w1 + b1)
    h = jax.nn.relu(h @ w2 + b2)
    return jax.nn.sigmoid(h @ w3 + b3)


if __name__ == "__main__":
    key = jax.random.PRNGKey(0)
    batch, embedding_dim = 8, 32

    kx, kp = jax.random.split(key)
    x = jax.random.normal(kx, (batch, embedding_dim), jnp.float32)
    params = init_params(kp, embedding_dim)
    kernel_params = prepare_kernel_params(params)

    # f32 input (exact PyTorch-module semantics at the boundary).
    out = binary_classifier_forward(x, kernel_params)
    jax.block_until_ready(out)
    assert out.shape == (batch, 1)
    assert jnp.allclose(out, reference_forward_mixed(x, params), atol=2e-3, rtol=2e-3)
    assert jnp.allclose(out, reference_forward_f32(x, params), atol=2e-2, rtol=2e-2)

    # bf16 input streamed end-to-end (halves the dominant HBM stream; producer-side cast).
    out_bf16 = binary_classifier_forward(x.astype(jnp.bfloat16), kernel_params)
    jax.block_until_ready(out_bf16)
    assert jnp.allclose(out_bf16, reference_forward_mixed(x, params), atol=2e-3, rtol=2e-3)

    # Non-multiple-of-8 batch exercises the pad-to-8 + cdiv edge-block path (grid of 2).
    x_odd = jax.random.normal(jax.random.fold_in(kx, 1), (13, embedding_dim), jnp.float32)
    out_odd = binary_classifier_forward(x_odd, kernel_params)
    jax.block_until_ready(out_odd)
    assert out_odd.shape == (13, 1)
    assert jnp.allclose(out_odd, reference_forward_mixed(x_odd, params), atol=2e-3, rtol=2e-3)

    print("KERNEL_OK")
</pallas_src>

<mosaic_0001>
module attributes {stable_mosaic.version = 11 : i64} {
  func.func @mlp_kernel(%arg0: i32, %arg1: memref<8x32xf32, #tpu.memory_space<vmem>>, %arg2: memref<32x128xbf16, #tpu.memory_space<vmem>>, %arg3: memref<1x128xf32, #tpu.memory_space<vmem>>, %arg4: memref<128x128xbf16, #tpu.memory_space<vmem>>, %arg5: memref<1x128xf32, #tpu.memory_space<vmem>>, %arg6: memref<1x128xf32, #tpu.memory_space<vmem>>, %arg7: memref<1xf32, #tpu.memory_space<smem>>, %arg8: memref<8x1xf32, #tpu.memory_space<vmem>>) attributes {dimension_semantics = [#tpu.dimension_semantics<parallel>], iteration_bounds = array<i64: 1>, scalar_prefetch = 0 : i64, scratch_operands = 0 : i64, tpu.core_type = #tpu.core_type<tc>, window_params = [{transform_indices = @transform_0, window_bounds = array<i64: 8, 32>}, {pipeline_mode = #tpu.pipeline_mode<synchronous>, transform_indices = @transform_1, window_bounds = array<i64: 32, 128>}, {pipeline_mode = #tpu.pipeline_mode<synchronous>, transform_indices = @transform_2, window_bounds = array<i64: 1, 128>}, {pipeline_mode = #tpu.pipeline_mode<synchronous>, transform_indices = @transform_3, window_bounds = array<i64: 128, 128>}, {pipeline_mode = #tpu.pipeline_mode<synchronous>, transform_indices = @transform_4, window_bounds = array<i64: 1, 128>}, {pipeline_mode = #tpu.pipeline_mode<synchronous>, transform_indices = @transform_5, window_bounds = array<i64: 1, 128>}, {transform_indices = @transform_6, window_bounds = array<i64: 1>}, {transform_indices = @transform_7, window_bounds = array<i64: 8, 1>}]} {
    %c0 = arith.constant 0 : index
    %c0_0 = arith.constant 0 : index
    %0 = vector.load %arg1[%c0, %c0_0] : memref<8x32xf32, #tpu.memory_space<vmem>>, vector<8x32xf32>
    %1 = arith.truncf %0 : vector<8x32xf32> to vector<8x32xbf16>
    %c0_1 = arith.constant 0 : index
    %c0_2 = arith.constant 0 : index
    %2 = vector.load %arg2[%c0_1, %c0_2] : memref<32x128xbf16, #tpu.memory_space<vmem>>, vector<32x128xbf16>
    %cst = arith.constant dense<0.000000e+00> : vector<8x128xf32>
    %3 = tpu.matmul %1, %2, %cst {dimension_numbers = #tpu.dot_dimension_numbers<[1], [0], [0], [1], [0, 0, 1, 1], [], []>} : vector<8x32xbf16>, vector<32x128xbf16>, vector<8x128xf32> -> vector<8x128xf32>
    %c0_3 = arith.constant 0 : index
    %c0_4 = arith.constant 0 : index
    %4 = vector.load %arg3[%c0_3, %c0_4] : memref<1x128xf32, #tpu.memory_space<vmem>>, vector<1x128xf32>
    %5 = vector.broadcast %4 : vector<1x128xf32> to vector<8x128xf32>
    %6 = arith.addf %3, %5 : vector<8x128xf32>
    %cst_5 = arith.constant 0.000000e+00 : f32
    %7 = vector.broadcast %cst_5 : f32 to vector<8x128xf32>
    %8 = arith.maximumf %6, %7 : vector<8x128xf32>
    %9 = arith.truncf %8 : vector<8x128xf32> to vector<8x128xbf16>
    %c0_6 = arith.constant 0 : index
    %c0_7 = arith.constant 0 : index
    %10 = vector.load %arg4[%c0_6, %c0_7] : memref<128x128xbf16, #tpu.memory_space<vmem>>, vector<128x128xbf16>
    %cst_8 = arith.constant dense<0.000000e+00> : vector<8x128xf32>
    %11 = tpu.matmul %9, %10, %cst_8 {dimension_numbers = #tpu.dot_dimension_numbers<[1], [0], [0], [1], [0, 0, 1, 1], [], []>} : vector<8x128xbf16>, vector<128x128xbf16>, vector<8x128xf32> -> vector<8x128xf32>
    %c0_9 = arith.constant 0 : index
    %c0_10 = arith.constant 0 : index
    %12 = vector.load %arg5[%c0_9, %c0_10] : memref<1x128xf32, #tpu.memory_space<vmem>>, vector<1x128xf32>
    %13 = vector.broadcast %12 : vector<1x128xf32> to vector<8x128xf32>
    %14 = arith.addf %11, %13 : vector<8x128xf32>
    %cst_11 = arith.constant 0.000000e+00 : f32
    %15 = vector.broadcast %cst_11 : f32 to vector<8x128xf32>
    %16 = arith.maximumf %14, %15 : vector<8x128xf32>
    %c0_12 = arith.constant 0 : index
    %c0_13 = arith.constant 0 : index
    %17 = vector.load %arg6[%c0_12, %c0_13] : memref<1x128xf32, #tpu.memory_space<vmem>>, vector<1x128xf32>
    %18 = vector.broadcast %17 : vector<1x128xf32> to vector<8x128xf32>
    %19 = arith.mulf %16, %18 : vector<8x128xf32>
    %cst_14 = arith.constant dense<0.000000e+00> : vector<8xf32>
    %20 = vector.multi_reduction <add>, %19, %cst_14 [1] : vector<8x128xf32> to vector<8xf32>
    %21 = vector.shape_cast %20 : vector<8xf32> to vector<8x1xf32>
    %c0_15 = arith.constant 0 : index
    %22 = memref.load %arg7[%c0_15] : memref<1xf32, #tpu.memory_space<smem>>
    %23 = vector.broadcast %22 : f32 to vector<8x1xf32>
    %24 = arith.addf %21, %23 : vector<8x1xf32>
    %cst_16 = arith.constant 5.000000e-01 : f32
    %25 = vector.broadcast %cst_16 : f32 to vector<8x1xf32>
    %26 = arith.mulf %25, %24 : vector<8x1xf32>
    %27 = math.tanh %26 : vector<8x1xf32>
    %cst_17 = arith.constant 1.000000e+00 : f32
    %28 = vector.broadcast %cst_17 : f32 to vector<8x1xf32>
    %29 = arith.addf %27, %28 : vector<8x1xf32>
    %cst_18 = arith.constant 5.000000e-01 : f32
    %30 = vector.broadcast %cst_18 : f32 to vector<8x1xf32>
    %31 = arith.mulf %30, %29 : vector<8x1xf32>
    %c0_19 = arith.constant 0 : index
    %c0_20 = arith.constant 0 : index
    %32 = vector.load %arg8[%c0_19, %c0_20] : memref<8x1xf32, #tpu.memory_space<vmem>>, vector<8x1xf32>
    tpu.vector_store %arg8[%c0_19, %c0_20], %31 {strides = array<i32>} : memref<8x1xf32, #tpu.memory_space<vmem>>, vector<8x1xf32>,
    return
  }
  func.func @transform_0(%arg0: i32) -> (i32, i32) {
    %c0_i32 = arith.constant 0 : i32
    %c0_i32_0 = arith.constant 0 : i32
    return %arg0, %c0_i32 : i32, i32
  }
  func.func @transform_1(%arg0: i32) -> (i32, i32) {
    %c0_i32 = arith.constant 0 : i32
    %c0_i32_0 = arith.constant 0 : i32
    %c0_i32_1 = arith.constant 0 : i32
    return %c0_i32, %c0_i32_0 : i32, i32
  }
  func.func @transform_2(%arg0: i32) -> (i32, i32) {
    %c0_i32 = arith.constant 0 : i32
    %c0_i32_0 = arith.constant 0 : i32
    %c0_i32_1 = arith.constant 0 : i32
    return %c0_i32, %c0_i32_0 : i32, i32
  }
  func.func @transform_3(%arg0: i32) -> (i32, i32) {
    %c0_i32 = arith.constant 0 : i32
    %c0_i32_0 = arith.constant 0 : i32
    %c0_i32_1 = arith.constant 0 : i32
    return %c0_i32, %c0_i32_0 : i32, i32
  }
  func.func @transform_4(%arg0: i32) -> (i32, i32) {
    %c0_i32 = arith.constant 0 : i32
    %c0_i32_0 = arith.constant 0 : i32
    %c0_i32_1 = arith.constant 0 : i32
    return %c0_i32, %c0_i32_0 : i32, i32
  }
  func.func @transform_5(%arg0: i32) -> (i32, i32) {
    %c0_i32 = arith.constant 0 : i32
    %c0_i32_0 = arith.constant 0 : i32
    %c0_i32_1 = arith.constant 0 : i32
    return %c0_i32, %c0_i32_0 : i32, i32
  }
  func.func @transform_6(%arg0: i32) -> i32 {
    %c0_i32 = arith.constant 0 : i32
    %c0_i32_0 = arith.constant 0 : i32
    return %c0_i32 : i32
  }
  func.func @transform_7(%arg0: i32) -> (i32, i32) {
    %c0_i32 = arith.constant 0 : i32
    %c0_i32_0 = arith.constant 0 : i32
    return %arg0, %c0_i32 : i32, i32
  }
}

</mosaic_0001>

<bundles_post_ra>
// kernel: tpu_custom_call.1
= control target key start
LH: loop header
LB: loop body
LE: loop exit
PB: predicated region body
PF: predicated region fallthrough
CT: control target
= control target key end

     0   :  { %13 = vsyncpa [#allocation4], 0  ;;  %s522_s0 = inlined_call_operand.hbm [shape: f32[8,32], index: 0, kind: input, shape index: {}]   ;;  %s523_s1 = inlined_call_operand.hbm [shape: bf16[32,128], index: 1, kind: input, shape index: {}]   ;;  %s524_s2 = inlined_call_operand.vmem [shape: f32[1,128], index: 2, kind: input, shape index: {}]   ;;  %s525_s3 = inlined_call_operand.hbm [shape: bf16[128,128], index: 3, kind: input, shape index: {}]   ;;  %s526_s4 = inlined_call_operand.vmem [shape: f32[1,128], index: 4, kind: input, shape index: {}]   ;;  %s527_s5 = inlined_call_operand.vmem [shape: f32[1,128], index: 5, kind: input, shape index: {}]   ;;  %s528_s6 = inlined_call_operand.<no memory space> [shape: f32[1], index: 6, kind: input, shape index: {}]   ;;  %s529_s7 = inlined_call_operand.vmem [shape: f32[8,1], index: 7, kind: output, shape index: {}]  }
   0x1   :  { %14 = vsyncpa [#allocation6], 0  ;;  %s418_s24 = smov [#allocation5]   ;;  %s348_s28 = scalar_lea.hbm %s523_s1, 256 }
   0x2   :  { %s30_s25 = sshll.u32 %s418_s24, 4  ;;  %p349_p0 = scmp.ne.s32.totalorder %s523_s1, %s348_s28  ;;  %s31_s25 = int_to_ptr.vmem [resolvable:$true] %s30_s25 }
   0x3   :  { %p352_p1 = scmp.lt.u32.totalorder %s348_s28, %s523_s1 }
   0x5   :  { %p354_p2 = pnand %p352_p1, %p349_p0 }
   0x7   :  { %357 = shalt.err (!%p354_p2)
}
   0x8   :  { %s358_s10 = scalar_lea.vmem %s31_s25, 256  ;;  %p363_p4 = scmp.lt.s32.totalorder %s31_s25, %s31_s25 }
   0x9   :  { %p359_p3 = scmp.ne.s32.totalorder %s31_s25, %s358_s10  ;;  %p364_p5 = scmp.lt.s32.totalorder %s358_s10, %s358_s10 }
   0xb   :  { %p365_p6 = por %p364_p5, %p363_p4 }
   0xd   :  { %p366_p7 = pnand %p365_p6, %p359_p3 }
   0xf   :  { %369 = shalt.err (!%p366_p7)
}
  0x10   :  { %s419_s11 = smov 64   ;;  %s420_s12 = smov 4  }
  0x11   :  { %36 = dma.hbm_to_vmem [thread:$0]  %s523_s1, 256, %s31_s25, [#allocation6], %s419_s11, %s419_s11, %s420_s12  }
  0x12   :  { %s421_s15 = smov [#allocation3]   ;;  %s422_s17 = smov [#allocation7]  }
  0x13   :  { %s21_s16 = sshll.u32 %s421_s15, 4  ;;  %s44_s18 = sshll.u32 %s422_s17, 4  ;;  %s22_s16 = int_to_ptr.vmem [resolvable:$true] %s21_s16  ;;  %s45_s18 = int_to_ptr.vmem [resolvable:$true] %s44_s18 }
  0x14   :  { %s370_s21 = scalar_lea.hbm %s522_s0, 128 }
  0x15   :  { %p371_p8 = scmp.ne.s32.totalorder %s522_s0, %s370_s21  ;;  %p374_p9 = scmp.lt.u32.totalorder %s370_s21, %s522_s0 }
  0x17   :  { %p376_p10 = pnand %p374_p9, %p371_p8 }
  0x19   :  { %379 = shalt.err (!%p376_p10)
}
  0x1a   :  { %s380_s1 = scalar_lea.vmem %s22_s16, 128  ;;  %p385_p12 = scmp.lt.s32.totalorder %s22_s16, %s22_s16 }
  0x1b   :  { %p381_p11 = scmp.ne.s32.totalorder %s22_s16, %s380_s1  ;;  %p386_p13 = scmp.lt.s32.totalorder %s380_s1, %s380_s1 }
  0x1d   :  { %p387_p0 = por %p386_p13, %p385_p12 }
  0x1f   :  { %p388_p1 = pnand %p387_p0, %p381_p11 }
  0x21   :  { %391 = shalt.err (!%p388_p1)
}
  0x22   :  { %24 = dma.hbm_to_vmem [thread:$0]  %s522_s0, 128, %s22_s16, [#allocation4]  }
  0x23   :  { %s392_s30 = scalar_lea.hbm %s525_s3, 1024 }
  0x24   :  { %p393_p2 = scmp.ne.s32.totalorder %s525_s3, %s392_s30  ;;  %p396_p3 = scmp.lt.u32.totalorder %s392_s30, %s525_s3 }
  0x26   :  { %p398_p4 = pnand %p396_p3, %p393_p2 }
  0x28   :  { %401 = shalt.err (!%p398_p4)
}
  0x29   :  { %s402_s14 = scalar_lea.vmem %s45_s18, 1024  ;;  %p407_p6 = scmp.lt.s32.totalorder %s45_s18, %s45_s18 }
  0x2a   :  { %p403_p5 = scmp.ne.s32.totalorder %s45_s18, %s402_s14  ;;  %p408_p7 = scmp.lt.s32.totalorder %s402_s14, %s402_s14 }
  0x2c   :  { %p409_p8 = por %p408_p7, %p407_p6 }
  0x2e   :  { %p410_p9 = pnand %p409_p8, %p403_p5 }
  0x30   :  { %413 = shalt.err (!%p410_p9)
}
  0x31   :  { %50 = dma.hbm_to_vmem [thread:$0]  %s525_s3, 1024, %s45_s18, [#allocation6], %s419_s11, %s419_s11, %s420_s12  }
  0x32   :  { %414 = dma.done.wait [#allocation4], 128  }
  0x33   :  { %415 = vsyncadd [#allocation4], 4294967168 }
  0x34   :  { %416 = dma.done.wait [#allocation6], 1280  }
  0x35   :  { %417 = vsyncadd [#allocation6], 4294966016  ;;  %v423_v0 = vmov 0.0   ;;  %vm424_vm0 = vmmov 0   ;;  %v336_v1 = vld [vmem:[#allocation5] sm:$0xff]   ;;  %v337_v2 = vld [vmem:[#allocation5 + $0x8] sm:$0xff]   ;;  %v261_v30 = vstv %s528_s6 }
  0x36   :  { %301 = vmatprep.subr.bf16.mxu0 %v423_v0  ;;  %305 = vmatprep.mubr.msk.bf16.mxu0 %vm424_vm0, %v423_v0  ;;  %v67_v3 = vld [vmem:[#allocation3] sm:$0xff]  ;;  %v338_v4 = vld [vmem:[#allocation7] sm:$0xff]   ;;  %vm92_vm1 = vcmask 261120   ;;  %v340_v7 = vld [vmem:[#allocation7 + $0x10] sm:$0xff]   ;;  %vm267_vm2 = vcmask 7168  }
  0x37   :  { %309 = vmatprep.subr.bf16.mxu1 %v423_v0  ;;  %325 = vmatprep.mubr.msk.bf16.mxu1 %vm424_vm0, %v423_v0  ;;  %v68_v5 = vpack.c.bf16 %v67_v3, %v67_v3  ;;  %v339_v6 = vld [vmem:[#allocation7 + $0x8] sm:$0xff]   ;;  %v341_v8 = vld [vmem:[#allocation7 + $0x18] sm:$0xff]   ;;  %v342_v9 = vld [vmem:[#allocation7 + $0x20] sm:$0xff]  }
  0x38   :  { %302 = vmatpush3.bf16.msra.mxu0 %v336_v1  ;;  %310 = vmatpush3.bf16.msra.mxu1 %v338_v4  ;;  %v343_v10 = vld [vmem:[#allocation7 + $0x28] sm:$0xff]   ;;  %v344_v11 = vld [vmem:[#allocation7 + $0x30] sm:$0xff]   ;;  %v345_v12 = vld [vmem:[#allocation7 + $0x38] sm:$0xff]  }
  0x39   :  { %303 = vmatprep.subr.bf16.mxu0 %v423_v0  ;;  %311 = vmatprep.subr.bf16.mxu1 %v423_v0  ;;  %v275_v13 = vld [vmem:[%s524_s2] ss:$0 sm:$0xff] }
  0x3a   :  { %v279_v21 = vld [vmem:[%s526_s4] ss:$0 sm:$0xff] }
  0x3b   :  { %v288_v26 = vld [vmem:[%s527_s5] ss:$0 sm:$0xff] }
  0x3c   :  { %304 = vmatpush3.bf16.msra.mxu0 %v337_v2  ;;  %312 = vmatpush3.bf16.msra.mxu1 %v339_v6 }
  0x3d   :  { %313 = vmatprep.subr.bf16.mxu1 %v423_v0 }
  0x3f   :  { %306 = vmatmul.mubr.msk.bf16.vlgmr.msra.gmra.mrb[0].mxu0 %vm92_vm1, %v68_v5 }
  0x40   :  { %314 = vmatpush3.bf16.msra.mxu1 %v340_v7 }
  0x41   :  { %315 = vmatprep.subr.bf16.mxu1 %v423_v0 }
  0x44   :  { %316 = vmatpush3.bf16.msra.mxu1 %v341_v8 }
  0x45   :  { %317 = vmatprep.subr.bf16.mxu1 %v423_v0 }
  0x48   :  { %318 = vmatpush3.bf16.msra.mxu1 %v342_v9 }
  0x49   :  { %319 = vmatprep.subr.bf16.mxu1 %v423_v0 }
  0x4c   :  { %320 = vmatpush3.bf16.msra.mxu1 %v343_v10 }
  0x4d   :  { %321 = vmatprep.subr.bf16.mxu1 %v423_v0 }
  0x50   :  { %322 = vmatpush3.bf16.msra.mxu1 %v344_v11 }
  0x51   :  { %323 = vmatprep.subr.bf16.mxu1 %v423_v0 }
  0x54   :  { %324 = vmatpush3.bf16.msra.mxu1 %v345_v12 }
 0x112   :  { %v130_v14 = vpop.f32.mrb[0].mxu0 }
 0x113   :  { %v131_v15 = vadd.f32 %v275_v13, %v130_v14  ;;  %v307_v16 = vpop.f32.mrb[1].mxu0 }
 0x114   :  { %v133_v17 = vpop.f32.mrb[2].mxu0 }
 0x115   :  { %v136_v18 = vmax.f32 %v131_v15, 0.0  ;;  %v308_v19 = vpop.f32.mrb[3].mxu0 }
 0x117   :  { %v137_v20 = vpack.c.bf16 %v136_v18, %v136_v18 }
 0x119   :  { %326 = vmatmul.mubr.bf16.vlgmr.msra.gmra.mrb[0].mxu1 %v137_v20 }
 0x1ec   :  { %v243_v22 = vpop.f32.mrb[0].mxu1 }
 0x1ed   :  { %v244_v23 = vadd.f32 %v279_v21, %v243_v22  ;;  %v327_v24 = vpop.f32.mrb[1].mxu1 }
 0x1ee   :  { %v246_v25 = vpop.f32.mrb[2].mxu1 }
 0x1ef   :  { %v249_v27 = vmax.f32 %v244_v23, 0.0  ;;  %v328_v28 = vpop.f32.mrb[3].mxu1 }
 0x1f1   :  { %v257_v29 = vmul.f32 %v288_v26, %v249_v27 }
 0x1f3   :  { %258 = vadd.xlane.f32.xlu0 %v257_v29 }
 0x280   :  { %v259_v31 = vpop.xlane.xlu0 %258 }
 0x281   :  { %v262_v32 = vadd.f32 %v261_v30, %v259_v31 }
 0x283   :  { %v263_v33 = vmul.f32 0.5, %v262_v32 }
 0x285   :  { %346 = vtanh.f32 %v263_v33 }
 0x28f   :  { %v347_v34 = vpop.eup %346 }
 0x290   :  { %v265_v35 = vadd.f32 1.0, %v347_v34 }
 0x292   :  { %v266_v36 = vmul.f32 0.5, %v265_v35 }
 0x294   :  { %268 = vst.msk [vmem:[%s529_s7] sm:$0xff] %vm267_vm2, %v266_v36 }
 0x295   :  { %273 = vsyncpa [#allocation4], 1 }
 0x296   :  { %274 = vsyncpa [#allocation6], 1 }

</bundles_post_ra>
